<compile_context>
chip_gen: v5e
topology: v5e:2x2
jax: 0.10.0
libtpu: 0.0.40
codegen_flags: <defaults>
</compile_context>

<pallas_src>
import functools

import jax
import jax.numpy as jnp
from jax.experimental import pallas as pl
from jax.experimental.pallas import tpu as pltpu

BN_EPS = 1e-5


def _round_up(x, m):
    return (x + m - 1) // m * m


def _gcn_agg_kernel(a_ref, xw_ref, s_ref, t_ref, o_ref):
    # A_norm row tile @ XW  (bf16 MXU inputs, f32 accumulation).
    h = jnp.dot(a_ref[...], xw_ref[...], preferred_element_type=jnp.float32)
    # Folded GCNConv-bias + BatchNorm (eval) affine, then ReLU. Lane-dense f32 store.
    o_ref[...] = jnp.maximum(h * s_ref[...] + t_ref[...], 0.0)
    # TODO(synk): Dropout(p=0.2) is identity in eval mode; training-mode RNG mask not emitted.
    # residual=False in TopologyGCN's GCNBlock, so no skip connection.


def build_normalized_adjacency(edge_index, num_nodes):
    """Dense D^-1/2 (A + I) D^-1/2 matching PyG GCNConv's gcn_norm (add_self_loops=True).

    edge_index: int32 [2, E], row = source, col = target. A[col, row] accumulates norm,
    so out = A @ X aggregates messages from sources into targets.
    """
    row, col = edge_index[0], edge_index[1]
    loop = jnp.arange(num_nodes, dtype=edge_index.dtype)
    row = jnp.concatenate([row, loop])
    col = jnp.concatenate([col, loop])
    ones = jnp.ones(row.shape[0], dtype=jnp.float32)
    deg = jnp.zeros((num_nodes,), jnp.float32).at[col].add(ones)
    deg_inv_sqrt = jnp.where(deg > 0, jax.lax.rsqrt(deg), 0.0)
    norm = deg_inv_sqrt[row] * deg_inv_sqrt[col]
    adj = jnp.zeros((num_nodes, num_nodes), jnp.float32).at[col, row].add(norm)
    return adj
    # TODO(synk): if face_edge_index is static across calls, cache A_norm (already in bf16)
    # instead of re-running this O(N^2) scatter each forward.


@functools.partial(jax.jit, static_argnames=("num_nodes",))
def topology_gcn_forward(topo_feat, face_edge_index, params, num_nodes):
    """topo_feat: f32 [N, in_dim]; face_edge_index: i32 [2, E] -> f32 [N, out_dim]."""
    n, in_dim = topo_feat.shape
    out_dim = params["w"].shape[1]

    # ---- normalized adjacency (plain JAX scatter glue), cast to bf16 for the MXU ----
    adj = build_normalized_adjacency(face_edge_index, num_nodes)

    # ---- padding plan: node axis -> row-tile multiple, feature axis -> 128 lanes ----
    tm = min(256, _round_up(n, 8))        # row tile (multiple of 8 sublanes, <=256)
    n_pad = _round_up(n, tm)
    f_pad = _round_up(out_dim, 128)       # lane-dense output (unmasked stores)

    adj_p = jnp.zeros((n_pad, n_pad), jnp.bfloat16).at[:n, :n].set(
        adj.astype(jnp.bfloat16))
    x_p = jnp.zeros((n_pad, in_dim), jnp.bfloat16).at[:n, :].set(
        topo_feat.astype(jnp.bfloat16))
    w_p = jnp.zeros((in_dim, f_pad), jnp.bfloat16).at[:, :out_dim].set(
        params["w"].astype(jnp.bfloat16))

    # ---- fold GCNConv bias + BatchNorm (eval, running stats) into scale/shift ----
    # BN(h + b) = h * s + t  with  s = gamma / sqrt(var+eps),  t = beta + (b - mean) * s
    s = params["gamma"] * jax.lax.rsqrt(params["var"] + BN_EPS)      # (1, out_dim)
    t = params["beta"] + (params["b"] - params["mean"]) * s          # (1, out_dim)
    s_p = jnp.zeros((1, f_pad), jnp.float32).at[:, :out_dim].set(s)
    t_p = jnp.zeros((1, f_pad), jnp.float32).at[:, :out_dim].set(t)

    # ---- feature transform X @ W computed ONCE (hoisted out of the row-tile loop) ----
    xw = jnp.dot(x_p, w_p, preferred_element_type=jnp.float32).astype(jnp.bfloat16)

    grid = (n_pad // tm,)
    out_p = pl.pallas_call(
        _gcn_agg_kernel,
        out_shape=jax.ShapeDtypeStruct((n_pad, f_pad), jnp.float32),
        grid=grid,
        in_specs=[
            pl.BlockSpec((tm, n_pad), lambda i: (i, 0)),     # A_norm row tile (pipelined)
            pl.BlockSpec((n_pad, f_pad), lambda i: (0, 0)),  # XW, resident in VMEM
            pl.BlockSpec((1, f_pad), lambda i: (0, 0)),      # folded scale
            pl.BlockSpec((1, f_pad), lambda i: (0, 0)),      # folded shift
        ],
        out_specs=pl.BlockSpec((tm, f_pad), lambda i: (i, 0)),
        compiler_params=pltpu.CompilerParams(
            dimension_semantics=("parallel",)),              # shards row tiles over 2 TCs on v7x
    )(adj_p, xw, s_p, t_p)
    # TODO(synk): for very large / sparse graphs, replace the dense (tm, N) A tile with a
    # block-CSR PrefetchScalarGridSpec path that skips all-zero adjacency blocks.

    return out_p[:n, :out_dim]


def _reference_forward(topo_feat, face_edge_index, params, num_nodes):
    """Pure-JAX f32 reference matching the PyTorch eval-mode forward."""
    adj = build_normalized_adjacency(face_edge_index, num_nodes)
    h = adj @ (topo_feat @ params["w"]) + params["b"]
    inv_std = jax.lax.rsqrt(params["var"] + BN_EPS)
    h = (h - params["mean"]) * inv_std * params["gamma"] + params["beta"]
    return jnp.maximum(h, 0.0)


def init_params(key, in_dim, out_dim):
    k_w, k_g, k_b, k_m, k_v = jax.random.split(key, 5)
    # GCNConv linear weight (glorot-ish), bias zeros (PyG default)
    scale = jnp.sqrt(6.0 / (in_dim + out_dim))
    w = jax.random.uniform(k_w, (in_dim, out_dim), jnp.float32, -scale, scale)
    b = jnp.zeros((1, out_dim), jnp.float32)
    # BatchNorm affine + running stats (deterministic, non-trivial)
    gamma = 1.0 + 0.1 * jax.random.normal(k_g, (1, out_dim), jnp.float32)
    beta = 0.1 * jax.random.normal(k_b, (1, out_dim), jnp.float32)
    mean = 0.05 * jax.random.normal(k_m, (1, out_dim), jnp.float32)
    var = 1.0 + 0.1 * jax.random.uniform(k_v, (1, out_dim), jnp.float32)
    return {"w": w, "b": b, "gamma": gamma, "beta": beta, "mean": mean, "var": var}


if __name__ == "__main__":
    num_faces = 384      # exercises padding (-> 512) and a 2-tile grid
    input_dim = 48
    output_dim = 32
    num_edges = 1024

    key = jax.random.PRNGKey(0)
    k_x, k_e, k_p = jax.random.split(key, 3)

    topo_feat = jax.random.normal(k_x, (num_faces, input_dim), jnp.float32)
    face_edge_index = jax.random.randint(
        k_e, (2, num_edges), 0, num_faces, dtype=jnp.int32)
    params = init_params(k_p, input_dim, output_dim)

    out = topology_gcn_forward(topo_feat, face_edge_index, params, num_faces)
    jax.block_until_ready(out)
    assert out.shape == (num_faces, output_dim)

    # Validate bf16-MXU path against the f32 reference (loose tolerance per bf16 inputs).
    ref = _reference_forward(topo_feat, face_edge_index, params, num_faces)
    assert jnp.allclose(out, ref, atol=0.25, rtol=0.05), float(jnp.max(jnp.abs(out - ref)))
    print("KERNEL_OK")
</pallas_src>

<mosaic_0001>
module attributes {stable_mosaic.version = 11 : i64} {
  func.func @_gcn_agg_kernel(%arg0: i32, %arg1: memref<256x512xbf16, #tpu.memory_space<vmem>>, %arg2: memref<512x128xbf16, #tpu.memory_space<vmem>>, %arg3: memref<1x128xf32, #tpu.memory_space<vmem>>, %arg4: memref<1x128xf32, #tpu.memory_space<vmem>>, %arg5: memref<256x128xf32, #tpu.memory_space<vmem>>) attributes {dimension_semantics = [#tpu.dimension_semantics<parallel>], iteration_bounds = array<i64: 2>, scalar_prefetch = 0 : i64, scratch_operands = 0 : i64, tpu.core_type = #tpu.core_type<tc>, window_params = [{transform_indices = @transform_0, window_bounds = array<i64: 256, 512>}, {pipeline_mode = #tpu.pipeline_mode<synchronous>, transform_indices = @transform_1, window_bounds = array<i64: 512, 128>}, {pipeline_mode = #tpu.pipeline_mode<synchronous>, transform_indices = @transform_2, window_bounds = array<i64: 1, 128>}, {pipeline_mode = #tpu.pipeline_mode<synchronous>, transform_indices = @transform_3, window_bounds = array<i64: 1, 128>}, {transform_indices = @transform_4, window_bounds = array<i64: 256, 128>}]} {
    %c0 = arith.constant 0 : index
    %c0_0 = arith.constant 0 : index
    %0 = vector.load %arg1[%c0, %c0_0] : memref<256x512xbf16, #tpu.memory_space<vmem>>, vector<256x512xbf16>
    %c0_1 = arith.constant 0 : index
    %c0_2 = arith.constant 0 : index
    %1 = vector.load %arg2[%c0_1, %c0_2] : memref<512x128xbf16, #tpu.memory_space<vmem>>, vector<512x128xbf16>
    %cst = arith.constant dense<0.000000e+00> : vector<256x128xf32>
    %2 = tpu.matmul %0, %1, %cst {dimension_numbers = #tpu.dot_dimension_numbers<[1], [0], [0], [1], [0, 0, 1, 1], [], []>} : vector<256x512xbf16>, vector<512x128xbf16>, vector<256x128xf32> -> vector<256x128xf32>
    %c0_3 = arith.constant 0 : index
    %c0_4 = arith.constant 0 : index
    %3 = vector.load %arg3[%c0_3, %c0_4] : memref<1x128xf32, #tpu.memory_space<vmem>>, vector<1x128xf32>
    %4 = vector.broadcast %3 : vector<1x128xf32> to vector<256x128xf32>
    %5 = arith.mulf %2, %4 : vector<256x128xf32>
    %c0_5 = arith.constant 0 : index
    %c0_6 = arith.constant 0 : index
    %6 = vector.load %arg4[%c0_5, %c0_6] : memref<1x128xf32, #tpu.memory_space<vmem>>, vector<1x128xf32>
    %7 = vector.broadcast %6 : vector<1x128xf32> to vector<256x128xf32>
    %8 = arith.addf %5, %7 : vector<256x128xf32>
    %cst_7 = arith.constant 0.000000e+00 : f32
    %9 = vector.broadcast %cst_7 : f32 to vector<256x128xf32>
    %10 = arith.maximumf %8, %9 : vector<256x128xf32>
    %c0_8 = arith.constant 0 : index
    %c0_9 = arith.constant 0 : index
    %11 = vector.load %arg5[%c0_8, %c0_9] : memref<256x128xf32, #tpu.memory_space<vmem>>, vector<256x128xf32>
    tpu.vector_store %arg5[%c0_8, %c0_9], %10 {strides = array<i32>} : memref<256x128xf32, #tpu.memory_space<vmem>>, vector<256x128xf32>,
    return
  }
  func.func @transform_0(%arg0: i32) -> (i32, i32) {
    %c0_i32 = arith.constant 0 : i32
    %c0_i32_0 = arith.constant 0 : i32
    return %arg0, %c0_i32 : i32, i32
  }
  func.func @transform_1(%arg0: i32) -> (i32, i32) {
    %c0_i32 = arith.constant 0 : i32
    %c0_i32_0 = arith.constant 0 : i32
    %c0_i32_1 = arith.constant 0 : i32
    return %c0_i32, %c0_i32_0 : i32, i32
  }
  func.func @transform_2(%arg0: i32) -> (i32, i32) {
    %c0_i32 = arith.constant 0 : i32
    %c0_i32_0 = arith.constant 0 : i32
    %c0_i32_1 = arith.constant 0 : i32
    return %c0_i32, %c0_i32_0 : i32, i32
  }
  func.func @transform_3(%arg0: i32) -> (i32, i32) {
    %c0_i32 = arith.constant 0 : i32
    %c0_i32_0 = arith.constant 0 : i32
    %c0_i32_1 = arith.constant 0 : i32
    return %c0_i32, %c0_i32_0 : i32, i32
  }
  func.func @transform_4(%arg0: i32) -> (i32, i32) {
    %c0_i32 = arith.constant 0 : i32
    %c0_i32_0 = arith.constant 0 : i32
    return %arg0, %c0_i32 : i32, i32
  }
}

</mosaic_0001>

<bundles_post_ra>
// kernel: mul.3
= control target key start
LH: loop header
LB: loop body
LE: loop exit
PB: predicated region body
PF: predicated region fallthrough
CT: control target
= control target key end

     0   :  { %s56_s0 = inlined_call_operand.vmem [shape: f32[1408], index: 0, kind: input, shape index: {}]   ;;  %s57_s1 = inlined_call_operand.vmem [shape: f32[1408], index: 1, kind: input, shape index: {}]   ;;  %s58_s2 = inlined_call_operand.vmem [shape: f32[1408], index: 2, kind: output, shape index: {}]  }
   0x1   :  { %v3_v0 = vld [vmem:[%s56_s0] sm:$0xff]  ;;  %v20_v2 = vld [vmem:[%s56_s0 + $0x8] sm:$0xff] }
   0x2   :  { %v4_v1 = vld [vmem:[%s57_s1] sm:$0xff]  ;;  %v21_v4 = vld [vmem:[%s57_s1 + $0x8] sm:$0xff] }
   0x3   :  { %v7_v3 = vmul.f32 %v4_v1, %v3_v0  ;;  %v16_v5 = vmul.f32 %v21_v4, %v20_v2 }
   0x5   :  { %9 = vst [vmem:[%s58_s2] sm:$0xff] %v7_v3 }
   0x6   :  { %22 = vst [vmem:[%s58_s2 + $0x8] sm:$0xff] %v16_v5 }

// kernel: topology_gcn_forward.1
= control target key start
LH: loop header
LB: loop body
LE: loop exit
PB: predicated region body
PF: predicated region fallthrough
CT: control target
= control target key end

     0   :  { %s1928_s15 = smov 0   ;;  %s2283_s0 = inlined_call_operand.vmem [shape: bf16[512,512], index: 0, kind: input, shape index: {}]   ;;  %s2284_s1 = inlined_call_operand.vmem [shape: bf16[512,128], index: 1, kind: input, shape index: {}]   ;;  %s2285_s2 = inlined_call_operand.vmem [shape: f32[1,128], index: 2, kind: input, shape index: {}]   ;;  %s2286_s3 = inlined_call_operand.vmem [shape: f32[1,128], index: 3, kind: input, shape index: {}]   ;;  %s2287_s4 = inlined_call_operand.vmem [shape: f32[512,128], index: 4, kind: output, shape index: {}]  }
   0x1 LB: > { %s1392_s16 = sadd.s32 4294967295, %s1901_s15   ;;  %p1396_p0 = scmp.ge.s32.totalorder %s1901_s15, 1  ;;  %s1901_s15 = sphi %s1928_s15, %s14_s15  }
   0x2   : > { %p164_p1 = scmp.lt.s32.totalorder %s1901_s15, 3 }
   0x4   : > { %p165_p2 = pnand %p1396_p0, %p164_p1 }
   0x5   : > { %s1397_s17 = sshll.u32 (!%p165_p2), %s1392_s16, 5 }
   0x6   : > { %168 = sbr.rel (%p165_p2) target bundleno = 436 (0x1b4), region = 36  ;;  %p192_p3 = scmp.lt.s32.totalorder (!%p165_p2), %s1397_s17, 63 }
   0xb   : > { %v1860_v0 = vld [vmem:[%s2284_s1 + $0x38] sm:$0xff]  ;;  %v1859_v4 = vld [vmem:[%s2284_s1 + $0x30] sm:$0xff]  ;;  %v1858_v8 = vld [vmem:[%s2284_s1 + $0x28] sm:$0xff]  ;;  %s2289_s17 = smov (!%p192_p3, %s1397_s17), 63 }
   0xc   : > { %v1868_v1 = vld [vmem:[%s2284_s1 + $0x78] sm:$0xff]  ;;  %844 = vmatpush.bf16.msra.mxu0 %v1860_v0  ;;  %v1867_v5 = vld [vmem:[%s2284_s1 + $0x70] sm:$0xff]  ;;  %v1866_v9 = vld [vmem:[%s2284_s1 + $0x68] sm:$0xff]  ;;  %s1788_s18 = sshll.u32 %s2289_s17, 4 }
   0xd   : > { %v1876_v2 = vld [vmem:[%s2284_s1 + $0xb8] sm:$0xff]  ;;  %933 = vmatpush.bf16.msra.mxu1 %v1868_v1  ;;  %v1875_v6 = vld [vmem:[%s2284_s1 + $0xb0] sm:$0xff]  ;;  %v1874_v10 = vld [vmem:[%s2284_s1 + $0xa8] sm:$0xff]  ;;  %s2020_s25 = scalar_lea.vmem %s2283_s0, %s1788_s18  ;;  %s1401_s18 = sshll.u32 %s2289_s17, 3 }
   0xe   : > { %v1884_v3 = vld [vmem:[%s2284_s1 + $0xf8] sm:$0xff]  ;;  %1022 = vmatpush.bf16.msra.mxu2 %v1876_v2  ;;  %v1883_v7 = vld [vmem:[%s2284_s1 + $0xf0] sm:$0xff]  ;;  %v1882_v11 = vld [vmem:[%s2284_s1 + $0xe8] sm:$0xff]  ;;  %s2136_s21 = scalar_lea.vmem %s2287_s4, %s1401_s18 }
   0xf   : > { %1111 = vmatpush.bf16.msra.mxu3 %v1884_v3  ;;  %v1857_v12 = vld [vmem:[%s2284_s1 + $0x20] sm:$0xff]  ;;  %v1856_v16 = vld [vmem:[%s2284_s1 + $0x18] sm:$0xff]  ;;  %v1855_v20 = vld [vmem:[%s2284_s1 + $0x10] sm:$0xff] }
  0x10   : > { %845 = vmatpush.bf16.msra.mxu0 %v1859_v4  ;;  %v1865_v13 = vld [vmem:[%s2284_s1 + $0x60] sm:$0xff]  ;;  %v1864_v17 = vld [vmem:[%s2284_s1 + $0x58] sm:$0xff]  ;;  %v1863_v21 = vld [vmem:[%s2284_s1 + $0x50] sm:$0xff] }
  0x11   : > { %934 = vmatpush.bf16.msra.mxu1 %v1867_v5  ;;  %v1873_v14 = vld [vmem:[%s2284_s1 + $0xa0] sm:$0xff]  ;;  %v1872_v18 = vld [vmem:[%s2284_s1 + $0x98] sm:$0xff]  ;;  %v1871_v22 = vld [vmem:[%s2284_s1 + $0x90] sm:$0xff] }
  0x12   : > { %1023 = vmatpush.bf16.msra.mxu2 %v1875_v6  ;;  %v1881_v15 = vld [vmem:[%s2284_s1 + $0xe0] sm:$0xff]  ;;  %v1880_v19 = vld [vmem:[%s2284_s1 + $0xd8] sm:$0xff]  ;;  %v1879_v23 = vld [vmem:[%s2284_s1 + $0xd0] sm:$0xff] }
  0x13   : > { %1112 = vmatpush.bf16.msra.mxu3 %v1883_v7  ;;  %v1854_v24 = vld [vmem:[%s2284_s1 + $0x8] sm:$0xff]  ;;  %v1853_v28 = vld [vmem:[%s2284_s1] sm:$0xff]  ;;  %v1791_v33 = vld [vmem:[%s2020_s25 + $0xc] sm:$0xf0] }
  0x14   : > { %846 = vmatpush.bf16.msra.mxu0 %v1858_v8  ;;  %v1862_v25 = vld [vmem:[%s2284_s1 + $0x48] sm:$0xff]  ;;  %v1861_v29 = vld [vmem:[%s2284_s1 + $0x40] sm:$0xff]  ;;  %v1406_v35 = vld [vmem:[%s2020_s25 + $0x10] sm:$0xf0] }
  0x15   : > { %935 = vmatpush.bf16.msra.mxu1 %v1866_v9  ;;  %v1870_v26 = vld [vmem:[%s2284_s1 + $0x88] sm:$0xff]  ;;  %v1869_v30 = vld [vmem:[%s2284_s1 + $0x80] sm:$0xff]  ;;  %v1792_v37 = vld [vmem:[%s2020_s25 + $0x14] sm:$0xf0] }
  0x16   : > { %1024 = vmatpush.bf16.msra.mxu2 %v1874_v10  ;;  %v1878_v27 = vld [vmem:[%s2284_s1 + $0xc8] sm:$0xff]  ;;  %v1877_v31 = vld [vmem:[%s2284_s1 + $0xc0] sm:$0xff]  ;;  %v1414_v39 = vld [vmem:[%s2020_s25 + $0x18] sm:$0xf0] }
  0x17   : > { %1113 = vmatpush.bf16.msra.mxu3 %v1882_v11  ;;  %v1404_v32 = vld [vmem:[%s2020_s25] sm:$0xf]  ;;  %v1789_v34 = vld [vmem:[%s2020_s25 + $0x4] sm:$0xf]  ;;  %v1412_v36 = vld [vmem:[%s2020_s25 + $0x8] sm:$0xf] }
  0x18   : > { %847 = vmatpush.bf16.msra.mxu0 %v1857_v12  ;;  %v1790_v38 = vld [vmem:[%s2020_s25 + $0xc] sm:$0xf]  ;;  %v1405_v40 = vor.u32 %v1791_v33, %v1404_v32  ;;  %v1409_v41 = vor.u32 %v1789_v34, %v1406_v35  ;;  %v1413_v42 = vor.u32 %v1792_v37, %v1412_v36  ;;  %v1420_v44 = vld [vmem:[%s2020_s25 + $0x20] sm:$0xf]  ;;  %v1795_v45 = vld [vmem:[%s2020_s25 + $0x2c] sm:$0xf0] }
  0x19   : > { %936 = vmatpush.bf16.msra.mxu1 %v1865_v13  ;;  %v1417_v43 = vor.u32 %v1790_v38, %v1414_v39  ;;  %v1793_v46 = vld [vmem:[%s2020_s25 + $0x24] sm:$0xf]  ;;  %v1422_v47 = vld [vmem:[%s2020_s25 + $0x30] sm:$0xf0]  ;;  %v1428_v48 = vld [vmem:[%s2020_s25 + $0x28] sm:$0xf]  ;;  %v1421_v52 = vor.u32 %v1795_v45, %v1420_v44 }
  0x1a   : > { %1025 = vmatpush.bf16.msra.mxu2 %v1873_v14  ;;  %v1796_v49 = vld [vmem:[%s2020_s25 + $0x34] sm:$0xf0]  ;;  %v1794_v50 = vld [vmem:[%s2020_s25 + $0x2c] sm:$0xf]  ;;  %v1430_v51 = vld [vmem:[%s2020_s25 + $0x38] sm:$0xf0]  ;;  %v1425_v53 = vor.u32 %v1793_v46, %v1422_v47 }
  0x1b   : > { %1114 = vmatpush.bf16.msra.mxu3 %v1881_v15  ;;  %v1429_v54 = vor.u32 %v1796_v49, %v1428_v48  ;;  %v1433_v55 = vor.u32 %v1794_v50, %v1430_v51  ;;  %v1436_v56 = vld [vmem:[%s2020_s25 + $0x40] sm:$0xf]  ;;  %v1799_v57 = vld [vmem:[%s2020_s25 + $0x4c] sm:$0xf0]  ;;  %v1797_v58 = vld [vmem:[%s2020_s25 + $0x44] sm:$0xf] }
  0x1c   : > { %848 = vmatpush.bf16.msra.mxu0 %v1856_v16  ;;  %v1438_v59 = vld [vmem:[%s2020_s25 + $0x50] sm:$0xf0]  ;;  %v1444_v60 = vld [vmem:[%s2020_s25 + $0x48] sm:$0xf]  ;;  %v1800_v61 = vld [vmem:[%s2020_s25 + $0x54] sm:$0xf0]  ;;  %v1437_v0 = vor.u32 %v1799_v57, %v1436_v56 }
  0x1d   : > { %937 = vmatpush.bf16.msra.mxu1 %v1864_v17  ;;  %v1798_v62 = vld [vmem:[%s2020_s25 + $0x4c] sm:$0xf]  ;;  %v1446_v63 = vld [vmem:[%s2020_s25 + $0x58] sm:$0xf0]  ;;  %v1441_v1 = vor.u32 %v1797_v58, %v1438_v59  ;;  %v1445_v2 = vor.u32 %v1800_v61, %v1444_v60  ;;  %v1452_v4 = vld [vmem:[%s2020_s25 + $0x60] sm:$0xf] }
  0x1e   : > { %1026 = vmatpush.bf16.msra.mxu2 %v1872_v18  ;;  %v1449_v3 = vor.u32 %v1798_v62, %v1446_v63  ;;  %v1803_v5 = vld [vmem:[%s2020_s25 + $0x6c] sm:$0xf0]  ;;  %v1801_v6 = vld [vmem:[%s2020_s25 + $0x64] sm:$0xf]  ;;  %v1454_v7 = vld [vmem:[%s2020_s25 + $0x70] sm:$0xf0] }
  0x1f   : > { %1115 = vmatpush.bf16.msra.mxu3 %v1880_v19  ;;  %v1460_v8 = vld [vmem:[%s2020_s25 + $0x68] sm:$0xf]  ;;  %v1804_v9 = vld [vmem:[%s2020_s25 + $0x74] sm:$0xf0]  ;;  %v1802_v10 = vld [vmem:[%s2020_s25 + $0x6c] sm:$0xf]  ;;  %v1453_v12 = vor.u32 %v1803_v5, %v1452_v4  ;;  %v1457_v13 = vor.u32 %v1801_v6, %v1454_v7 }
  0x20   : > { %849 = vmatpush.bf16.msra.mxu0 %v1855_v20  ;;  %v1462_v11 = vld [vmem:[%s2020_s25 + $0x78] sm:$0xf0]  ;;  %v1461_v14 = vor.u32 %v1804_v9, %v1460_v8  ;;  %v1468_v16 = vld [vmem:[%s2020_s25 + $0x80] sm:$0xf]  ;;  %v1807_v17 = vld [vmem:[%s2020_s25 + $0x8c] sm:$0xf0] }
  0x21   : > { %938 = vmatpush.bf16.msra.mxu1 %v1863_v21  ;;  %v1465_v15 = vor.u32 %v1802_v10, %v1462_v11  ;;  %v1805_v18 = vld [vmem:[%s2020_s25 + $0x84] sm:$0xf]  ;;  %v1470_v19 = vld [vmem:[%s2020_s25 + $0x90] sm:$0xf0]  ;;  %v1476_v20 = vld [vmem:[%s2020_s25 + $0x88] sm:$0xf] }
  0x22   : > { %1027 = vmatpush.bf16.msra.mxu2 %v1871_v22  ;;  %v1808_v21 = vld [vmem:[%s2020_s25 + $0x94] sm:$0xf0]  ;;  %v1806_v22 = vld [vmem:[%s2020_s25 + $0x8c] sm:$0xf]  ;;  %v1492_v32 = vld [vmem:[%s2020_s25 + $0xa8] sm:$0xf] }
  0x23   : > { %1116 = vmatpush.bf16.msra.mxu3 %v1879_v23  ;;  %v1478_v23 = vld [vmem:[%s2020_s25 + $0x98] sm:$0xf0]  ;;  %v1812_v33 = vld [vmem:[%s2020_s25 + $0xb4] sm:$0xf0]  ;;  %v1810_v34 = vld [vmem:[%s2020_s25 + $0xac] sm:$0xf] }
  0x24   : > { %850 = vmatpush.bf16.msra.mxu0 %v1854_v24  ;;  %v1469_v24 = vor.u32 %v1807_v17, %v1468_v16  ;;  %v1494_v35 = vld [vmem:[%s2020_s25 + $0xb8] sm:$0xf0]  ;;  %v1493_v38 = vor.u32 %v1812_v33, %v1492_v32  ;;  %v1508_v44 = vld [vmem:[%s2020_s25 + $0xc8] sm:$0xf]  ;;  %v1816_v45 = vld [vmem:[%s2020_s25 + $0xd4] sm:$0xf0] }
  0x25   : > { %939 = vmatpush.bf16.msra.mxu1 %v1862_v25  ;;  %v1473_v25 = vor.u32 %v1805_v18, %v1470_v19  ;;  %v1497_v39 = vor.u32 %v1810_v34, %v1494_v35  ;;  %v1814_v46 = vld [vmem:[%s2020_s25 + $0xcc] sm:$0xf]  ;;  %v1510_v47 = vld [vmem:[%s2020_s25 + $0xd8] sm:$0xf0]  ;;  %v1509_v50 = vor.u32 %v1816_v45, %v1508_v44  ;;  %v1524_v56 = vld [vmem:[%s2020_s25 + $0xe8] sm:$0xf] }
  0x26   : > { %1028 = vmatpush.bf16.msra.mxu2 %v1870_v26  ;;  %v1477_v26 = vor.u32 %v1808_v21, %v1476_v20  ;;  %v1513_v51 = vor.u32 %v1814_v46, %v1510_v47  ;;  %v1820_v57 = vld [vmem:[%s2020_s25 + $0xf4] sm:$0xf0]  ;;  %v1818_v58 = vld [vmem:[%s2020_s25 + $0xec] sm:$0xf]  ;;  %v1526_v59 = vld [vmem:[%s2020_s25 + $0xf8] sm:$0xf0] }
  0x27   : > { %1117 = vmatpush.bf16.msra.mxu3 %v1878_v27  ;;  %v1481_v27 = vor.u32 %v1806_v22, %v1478_v23  ;;  %v1525_v62 = vor.u32 %v1820_v57, %v1524_v56  ;;  %v1529_v63 = vor.u32 %v1818_v58, %v1526_v59  ;;  %v1540_v4 = vld [vmem:[%s2020_s25 + $0x108] sm:$0xf]  ;;  %v1824_v5 = vld [vmem:[%s2020_s25 + $0x114] sm:$0xf0]  ;;  %v1822_v6 = vld [vmem:[%s2020_s25 + $0x10c] sm:$0xf] }
  0x28   : > { %851 = vmatpush.bf16.msra.mxu0 %v1853_v28  ;;  %v1484_v28 = vld [vmem:[%s2020_s25 + $0xa0] sm:$0xf]  ;;  %v1542_v7 = vld [vmem:[%s2020_s25 + $0x118] sm:$0xf0]  ;;  %v1831_v56 = vld [vmem:[%s2020_s25 + $0x14c] sm:$0xf0] }
  0x29   : > { %940 = vmatpush.bf16.msra.mxu1 %v1861_v29  ;;  %v1811_v29 = vld [vmem:[%s2020_s25 + $0xac] sm:$0xf0]  ;;  %v2115_v18 = vld [vmem:[%s2285_s2] ss:$0 sm:$0xff]  ;;  %v1829_v58 = vld [vmem:[%s2020_s25 + $0x144] sm:$0xf] }
  0x2a   : > { %1029 = vmatpush.bf16.msra.mxu2 %v1869_v30  ;;  %v1809_v30 = vld [vmem:[%s2020_s25 + $0xa4] sm:$0xf]  ;;  %v1485_v36 = vor.u32 %v1811_v29, %v1484_v28  ;;  %v2120_v22 = vld [vmem:[%s2286_s3] ss:$0 sm:$0xff]  ;;  %v1556_v28 = vld [vmem:[%s2020_s25 + $0x128] sm:$0xf] }
  0x2b   : > { %1118 = vmatpush.bf16.msra.mxu3 %v1877_v31  ;;  %852 = vmatmul.bf16.vlgmr.msra.gmra.mxu0 %v1405_v40  ;;  %v1486_v31 = vld [vmem:[%s2020_s25 + $0xb0] sm:$0xf0]  ;;  %v1500_v40 = vld [vmem:[%s2020_s25 + $0xc0] sm:$0xf]  ;;  %v1828_v29 = vld [vmem:[%s2020_s25 + $0x134] sm:$0xf0] }
  0x2c   : > { %941 = vmatmul.bf16.vlgmr.msra.gmra.mxu1 %v1409_v41  ;;  %v1489_v37 = vor.u32 %v1809_v30, %v1486_v31  ;;  %v1815_v41 = vld [vmem:[%s2020_s25 + $0xcc] sm:$0xf0]  ;;  %v1548_v23 = vld [vmem:[%s2020_s25 + $0x120] sm:$0xf]  ;;  %v1826_v30 = vld [vmem:[%s2020_s25 + $0x12c] sm:$0xf] }
  0x2d   : > { %1030 = vmatmul.bf16.vlgmr.msra.gmra.mxu2 %v1413_v42  ;;  %v1813_v42 = vld [vmem:[%s2020_s25 + $0xc4] sm:$0xf]  ;;  %v1501_v48 = vor.u32 %v1815_v41, %v1500_v40  ;;  %v1558_v31 = vld [vmem:[%s2020_s25 + $0x138] sm:$0xf0]  ;;  %v1566_v59 = vld [vmem:[%s2020_s25 + $0x150] sm:$0xf0] }
  0x2e   : > { %1119 = vmatmul.bf16.vlgmr.msra.gmra.mxu3 %v1417_v43  ;;  %v1502_v43 = vld [vmem:[%s2020_s25 + $0xd0] sm:$0xf0] }
  0x2f   : > { %v1505_v49 = vor.u32 %v1813_v42, %v1502_v43  ;;  %v1557_v42 = vor.u32 %v1828_v29, %v1556_v28  ;;  %v1561_v43 = vor.u32 %v1826_v30, %v1558_v31  ;;  %v1833_v28 = vld [vmem:[%s2020_s25 + $0x164] sm:$0xf]  ;;  %v1582_v29 = vld [vmem:[%s2020_s25 + $0x170] sm:$0xf0]  ;;  %v1588_v30 = vld [vmem:[%s2020_s25 + $0x168] sm:$0xf] }
  0x30   : > { %v1836_v31 = vld [vmem:[%s2020_s25 + $0x174] sm:$0xf0] }
  0x3b   : > { %857 = vmatmul.bf16.gmra.mxu0 %v1421_v52  ;;  %v1516_v52 = vld [vmem:[%s2020_s25 + $0xe0] sm:$0xf] }
  0x3c   : > { %946 = vmatmul.bf16.gmra.mxu1 %v1425_v53  ;;  %v1819_v53 = vld [vmem:[%s2020_s25 + $0xec] sm:$0xf0] }
  0x3d   : > { %1035 = vmatmul.bf16.gmra.mxu2 %v1429_v54  ;;  %v1817_v54 = vld [vmem:[%s2020_s25 + $0xe4] sm:$0xf]  ;;  %v1517_v60 = vor.u32 %v1819_v53, %v1516_v52 }
  0x3e   : > { %1124 = vmatmul.bf16.gmra.mxu3 %v1433_v55  ;;  %v1518_v55 = vld [vmem:[%s2020_s25 + $0xf0] sm:$0xf0] }
  0x3f   : > { %v1521_v61 = vor.u32 %v1817_v54, %v1518_v55  ;;  %v1564_v55 = vld [vmem:[%s2020_s25 + $0x140] sm:$0xf] }
  0x4b   : > { %862 = vmatmul.bf16.gmra.mxu0 %v1437_v0  ;;  %v1532_v0 = vld [vmem:[%s2020_s25 + $0x100] sm:$0xf] }
  0x4c   : > { %951 = vmatmul.bf16.gmra.mxu1 %v1441_v1  ;;  %v1823_v1 = vld [vmem:[%s2020_s25 + $0x10c] sm:$0xf0] }
  0x4d   : > { %1040 = vmatmul.bf16.gmra.mxu2 %v1445_v2  ;;  %v1821_v2 = vld [vmem:[%s2020_s25 + $0x104] sm:$0xf]  ;;  %v1533_v8 = vor.u32 %v1823_v1, %v1532_v0 }
  0x4e   : > { %1129 = vmatmul.bf16.gmra.mxu3 %v1449_v3  ;;  %v1534_v3 = vld [vmem:[%s2020_s25 + $0x110] sm:$0xf0] }
  0x4f   : > { %v1537_v9 = vor.u32 %v1821_v2, %v1534_v3 }
  0x5b   : > { %867 = vmatmul.bf16.gmra.mxu0 %v1453_v12  ;;  %v1541_v12 = vor.u32 %v1824_v5, %v1540_v4  ;;  %v1565_v4 = vor.u32 %v1831_v56, %v1564_v55  ;;  %v1569_v5 = vor.u32 %v1829_v58, %v1566_v59  ;;  %v1839_v58 = vld [vmem:[%s2020_s25 + $0x18c] sm:$0xf0] }
  0x5c   : > { %956 = vmatmul.bf16.gmra.mxu1 %v1457_v13  ;;  %v1545_v13 = vor.u32 %v1822_v6, %v1542_v7 }
  0x5d   : > { %1045 = vmatmul.bf16.gmra.mxu2 %v1461_v14 }
  0x5e   : > { %1134 = vmatmul.bf16.gmra.mxu3 %v1465_v15 }
  0x6b   : > { %872 = vmatmul.bf16.gmra.mxu0 %v1469_v24  ;;  %v1827_v24 = vld [vmem:[%s2020_s25 + $0x12c] sm:$0xf0] }
  0x6c   : > { %961 = vmatmul.bf16.gmra.mxu1 %v1473_v25 }
  0x6d   : > { %1050 = vmatmul.bf16.gmra.mxu2 %v1477_v26  ;;  %v1825_v26 = vld [vmem:[%s2020_s25 + $0x124] sm:$0xf] }
  0x6e   : > { %1139 = vmatmul.bf16.gmra.mxu3 %v1481_v27  ;;  %v1550_v27 = vld [vmem:[%s2020_s25 + $0x130] sm:$0xf0] }
  0x7b   : > { %877 = vmatmul.bf16.gmra.mxu0 %v1485_v36  ;;  %v1549_v36 = vor.u32 %v1827_v24, %v1548_v23 }
  0x7c   : > { %966 = vmatmul.bf16.gmra.mxu1 %v1489_v37  ;;  %v1553_v37 = vor.u32 %v1825_v26, %v1550_v27  ;;  %v1835_v26 = vld [vmem:[%s2020_s25 + $0x16c] sm:$0xf0] }
  0x7d   : > { %1055 = vmatmul.bf16.gmra.mxu2 %v1493_v38 }
  0x7e   : > { %1144 = vmatmul.bf16.gmra.mxu3 %v1497_v39 }
  0x8b   : > { %882 = vmatmul.bf16.gmra.mxu0 %v1501_v48 }
  0x8c   : > { %971 = vmatmul.bf16.gmra.mxu1 %v1505_v49 }
  0x8d   : > { %1060 = vmatmul.bf16.gmra.mxu2 %v1509_v50 }
  0x8e   : > { %1149 = vmatmul.bf16.gmra.mxu3 %v1513_v51 }
  0x9b   : > { %887 = vmatmul.bf16.gmra.mxu0 %v1517_v60  ;;  %v1572_v60 = vld [vmem:[%s2020_s25 + $0x148] sm:$0xf] }
  0x9c   : > { %976 = vmatmul.bf16.gmra.mxu1 %v1521_v61  ;;  %v1832_v61 = vld [vmem:[%s2020_s25 + $0x154] sm:$0xf0] }
  0x9d   : > { %1065 = vmatmul.bf16.gmra.mxu2 %v1525_v62  ;;  %v1830_v62 = vld [vmem:[%s2020_s25 + $0x14c] sm:$0xf] }
  0x9e   : > { %1154 = vmatmul.bf16.gmra.mxu3 %v1529_v63  ;;  %v1574_v63 = vld [vmem:[%s2020_s25 + $0x158] sm:$0xf0] }
  0xa8   : > { %v853_v10 = vpop.f32.mrf.mxu0 }
  0xa9   : > { %v942_v11 = vpop.f32.mrf.mxu1 }
  0xaa   : > { %v943_v14 = vadd.f32 %v942_v11, %v853_v10  ;;  %v1573_v10 = vor.u32 %v1832_v61, %v1572_v60  ;;  %v1577_v11 = vor.u32 %v1830_v62, %v1574_v63  ;;  %v1837_v60 = vld [vmem:[%s2020_s25 + $0x184] sm:$0xf]  ;;  %v1598_v61 = vld [vmem:[%s2020_s25 + $0x190] sm:$0xf0]  ;;  %v1604_v62 = vld [vmem:[%s2020_s25 + $0x188] sm:$0xf] }
  0xab   : > { %892 = vmatmul.bf16.gmra.mxu0 %v1533_v8  ;;  %v1840_v63 = vld [vmem:[%s2020_s25 + $0x194] sm:$0xf0] }
  0xac   : > { %981 = vmatmul.bf16.gmra.mxu1 %v1537_v9 }
  0xad   : > { %1070 = vmatmul.bf16.gmra.mxu2 %v1541_v12 }
  0xae   : > { %1159 = vmatmul.bf16.gmra.mxu3 %v1545_v13 }
  0xb0   : > { %v1031_v15 = vpop.f32.mrf.mxu2  ;;  %v855_v19 = vpop.f32.mrf.mxu0 }
  0xb1   : > { %v1120_v16 = vpop.f32.mrf.mxu3  ;;  %v1032_v17 = vadd.f32 %v1031_v15, %v943_v14  ;;  %v944_v20 = vpop.f32.mrf.mxu1 }
  0xb2   : > { %v945_v33 = vadd.f32 %v944_v20, %v855_v19 }
  0xb3   : > { %v1121_v21 = vadd.f32 %v1120_v16, %v1032_v17 }
  0xb5   : > { %v1204_v25 = vmul.f32 %v2115_v18, %v1121_v21 }
  0xb7   : > { %v1240_v32 = vadd.f32 %v2120_v22, %v1204_v25  ;;  %v1580_v25 = vld [vmem:[%s2020_s25 + $0x160] sm:$0xf] }
  0xb8   : > { %v1033_v34 = vpop.f32.mrf.mxu2  ;;  %v858_v40 = vpop.f32.mrf.mxu0 }
  0xb9   : > { %v1122_v35 = vpop.f32.mrf.mxu3  ;;  %v1272_v38 = vmax.f32 %v1240_v32, 0.0  ;;  %v1034_v39 = vadd.f32 %v1033_v34, %v945_v33  ;;  %v947_v41 = vpop.f32.mrf.mxu1  ;;  %v1834_v32 = vld [vmem:[%s2020_s25 + $0x16c] sm:$0xf]  ;;  %v1590_v33 = vld [vmem:[%s2020_s25 + $0x178] sm:$0xf0] }
  0xba   : > { %v948_v46 = vadd.f32 %v947_v41, %v858_v40 }
  0xbb   : > { %1304 = vst [vmem:[%s2136_s21] sm:$0xff] %v1272_v38  ;;  %v1123_v44 = vadd.f32 %v1122_v35, %v1034_v39  ;;  %897 = vmatmul.bf16.gmra.mxu0 %v1549_v36  ;;  %v1581_v38 = vor.u32 %v1835_v26, %v1580_v25  ;;  %v1585_v39 = vor.u32 %v1833_v28, %v1582_v29  ;;  %v1843_v28 = vld [vmem:[%s2020_s25 + $0x1ac] sm:$0xf0] }
  0xbc   : > { %986 = vmatmul.bf16.gmra.mxu1 %v1553_v37 }
  0xbd   : > { %v1205_v45 = vmul.f32 %v2115_v18, %v1123_v44  ;;  %1075 = vmatmul.bf16.gmra.mxu2 %v1557_v42  ;;  %v1589_v44 = vor.u32 %v1836_v31, %v1588_v30  ;;  %v1841_v30 = vld [vmem:[%s2020_s25 + $0x1a4] sm:$0xf]  ;;  %v1614_v31 = vld [vmem:[%s2020_s25 + $0x1b0] sm:$0xf0] }
  0xbe   : > { %1164 = vmatmul.bf16.gmra.mxu3 %v1561_v43 }
  0xbf   : > { %v1241_v47 = vadd.f32 %v2120_v22, %v1205_v45  ;;  %v1593_v45 = vor.u32 %v1834_v32, %v1590_v33  ;;  %v1620_v32 = vld [vmem:[%s2020_s25 + $0x1a8] sm:$0xf]  ;;  %v1844_v33 = vld [vmem:[%s2020_s25 + $0x1b4] sm:$0xf0] }
  0xc0   : > { %v1036_v48 = vpop.f32.mrf.mxu2  ;;  %v860_v52 = vpop.f32.mrf.mxu0 }
  0xc1   : > { %v1125_v49 = vpop.f32.mrf.mxu3  ;;  %v1273_v50 = vmax.f32 %v1241_v47, 0.0  ;;  %v1037_v51 = vadd.f32 %v1036_v48, %v948_v46  ;;  %v949_v53 = vpop.f32.mrf.mxu1 }
  0xc2   : > { %v950_v1 = vadd.f32 %v949_v53, %v860_v52 }
  0xc3   : > { %1305 = vst [vmem:[%s2136_s21 + $0x8] sm:$0xff] %v1273_v50  ;;  %v1126_v54 = vadd.f32 %v1125_v49, %v1037_v51 }
  0xc5   : > { %v1206_v57 = vmul.f32 %v2115_v18, %v1126_v54 }
  0xc7   : > { %v1242_v0 = vadd.f32 %v2120_v22, %v1206_v57  ;;  %v1596_v57 = vld [vmem:[%s2020_s25 + $0x180] sm:$0xf] }
  0xc8   : > { %v1038_v2 = vpop.f32.mrf.mxu2  ;;  %v863_v8 = vpop.f32.mrf.mxu0 }
  0xc9   : > { %v1127_v3 = vpop.f32.mrf.mxu3  ;;  %v1274_v6 = vmax.f32 %v1242_v0, 0.0  ;;  %v1039_v7 = vadd.f32 %v1038_v2, %v950_v1  ;;  %v952_v9 = vpop.f32.mrf.mxu1  ;;  %v1838_v0 = vld [vmem:[%s2020_s25 + $0x18c] sm:$0xf]  ;;  %v1606_v1 = vld [vmem:[%s2020_s25 + $0x198] sm:$0xf0] }
  0xca   : > { %v953_v14 = vadd.f32 %v952_v9, %v863_v8 }
  0xcb   : > { %1306 = vst [vmem:[%s2136_s21 + $0x10] sm:$0xff] %v1274_v6  ;;  %v1128_v12 = vadd.f32 %v1127_v3, %v1039_v7  ;;  %902 = vmatmul.bf16.gmra.mxu0 %v1565_v4  ;;  %v1597_v6 = vor.u32 %v1839_v58, %v1596_v57  ;;  %v1601_v7 = vor.u32 %v1837_v60, %v1598_v61  ;;  %v1847_v60 = vld [vmem:[%s2020_s25 + $0x1cc] sm:$0xf0] }
  0xcc   : > { %991 = vmatmul.bf16.gmra.mxu1 %v1569_v5 }
  0xcd   : > { %v1207_v13 = vmul.f32 %v2115_v18, %v1128_v12  ;;  %1080 = vmatmul.bf16.gmra.mxu2 %v1573_v10  ;;  %v1605_v12 = vor.u32 %v1840_v63, %v1604_v62  ;;  %v1845_v62 = vld [vmem:[%s2020_s25 + $0x1c4] sm:$0xf]  ;;  %v1630_v63 = vld [vmem:[%s2020_s25 + $0x1d0] sm:$0xf0] }
  0xce   : > { %1169 = vmatmul.bf16.gmra.mxu3 %v1577_v11 }
  0xcf   : > { %v1243_v15 = vadd.f32 %v2120_v22, %v1207_v13  ;;  %v1609_v13 = vor.u32 %v1838_v0, %v1606_v1  ;;  %v1636_v0 = vld [vmem:[%s2020_s25 + $0x1c8] sm:$0xf]  ;;  %v1848_v1 = vld [vmem:[%s2020_s25 + $0x1d4] sm:$0xf0] }
  0xd0   : > { %v1041_v16 = vpop.f32.mrf.mxu2  ;;  %v865_v21 = vpop.f32.mrf.mxu0 }
  0xd1   : > { %v1130_v17 = vpop.f32.mrf.mxu3  ;;  %v1275_v19 = vmax.f32 %v1243_v15, 0.0  ;;  %v1042_v20 = vadd.f32 %v1041_v16, %v953_v14  ;;  %v954_v23 = vpop.f32.mrf.mxu1 }
  0xd2   : > { %v955_v35 = vadd.f32 %v954_v23, %v865_v21 }
  0xd3   : > { %1307 = vst [vmem:[%s2136_s21 + $0x18] sm:$0xff] %v1275_v19  ;;  %v1131_v24 = vadd.f32 %v1130_v17, %v1042_v20 }
  0xd5   : > { %v1208_v27 = vmul.f32 %v2115_v18, %v1131_v24 }
  0xd7   : > { %v1244_v34 = vadd.f32 %v2120_v22, %v1208_v27  ;;  %v1612_v27 = vld [vmem:[%s2020_s25 + $0x1a0] sm:$0xf] }
  0xd8   : > { %v1043_v36 = vpop.f32.mrf.mxu2  ;;  %v868_v42 = vpop.f32.mrf.mxu0 }
  0xd9   : > { %v1132_v37 = vpop.f32.mrf.mxu3  ;;  %v1276_v40 = vmax.f32 %v1244_v34, 0.0  ;;  %v1044_v41 = vadd.f32 %v1043_v36, %v955_v35  ;;  %v957_v43 = vpop.f32.mrf.mxu1  ;;  %v1842_v34 = vld [vmem:[%s2020_s25 + $0x1ac] sm:$0xf]  ;;  %v1622_v35 = vld [vmem:[%s2020_s25 + $0x1b8] sm:$0xf0] }
  0xda   : > { %v958_v48 = vadd.f32 %v957_v43, %v868_v42 }
  0xdb   : > { %1308 = vst [vmem:[%s2136_s21 + $0x20] sm:$0xff] %v1276_v40  ;;  %v1133_v46 = vadd.f32 %v1132_v37, %v1044_v41  ;;  %907 = vmatmul.bf16.gmra.mxu0 %v1581_v38  ;;  %v1613_v40 = vor.u32 %v1843_v28, %v1612_v27  ;;  %v1617_v41 = vor.u32 %v1841_v30, %v1614_v31  ;;  %v1851_v30 = vld [vmem:[%s2020_s25 + $0x1ec] sm:$0xf0] }
  0xdc   : > { %996 = vmatmul.bf16.gmra.mxu1 %v1585_v39 }
  0xdd   : > { %v1209_v47 = vmul.f32 %v2115_v18, %v1133_v46  ;;  %1085 = vmatmul.bf16.gmra.mxu2 %v1589_v44  ;;  %v1621_v46 = vor.u32 %v1844_v33, %v1620_v32  ;;  %v1849_v32 = vld [vmem:[%s2020_s25 + $0x1e4] sm:$0xf]  ;;  %v1646_v33 = vld [vmem:[%s2020_s25 + $0x1f0] sm:$0xf0] }
  0xde   : > { %1174 = vmatmul.bf16.gmra.mxu3 %v1593_v45 }
  0xdf   : > { %v1245_v49 = vadd.f32 %v2120_v22, %v1209_v47  ;;  %v1625_v47 = vor.u32 %v1842_v34, %v1622_v35  ;;  %v1652_v34 = vld [vmem:[%s2020_s25 + $0x1e8] sm:$0xf]  ;;  %v1852_v35 = vld [vmem:[%s2020_s25 + $0x1f4] sm:$0xf0] }
  0xe0   : > { %v1046_v50 = vpop.f32.mrf.mxu2  ;;  %v870_v54 = vpop.f32.mrf.mxu0 }
  0xe1   : > { %v1135_v51 = vpop.f32.mrf.mxu3  ;;  %v1277_v52 = vmax.f32 %v1245_v49, 0.0  ;;  %v1047_v53 = vadd.f32 %v1046_v50, %v958_v48  ;;  %v959_v55 = vpop.f32.mrf.mxu1 }
  0xe2   : > { %v960_v3 = vadd.f32 %v959_v55, %v870_v54 }
  0xe3   : > { %1309 = vst [vmem:[%s2136_s21 + $0x28] sm:$0xff] %v1277_v52  ;;  %v1136_v56 = vadd.f32 %v1135_v51, %v1047_v53 }
  0xe5   : > { %v1210_v59 = vmul.f32 %v2115_v18, %v1136_v56 }
  0xe7   : > { %v1246_v2 = vadd.f32 %v2120_v22, %v1210_v59  ;;  %v1628_v59 = vld [vmem:[%s2020_s25 + $0x1c0] sm:$0xf] }
  0xe8   : > { %v1048_v4 = vpop.f32.mrf.mxu2  ;;  %v873_v10 = vpop.f32.mrf.mxu0 }
  0xe9   : > { %v1137_v5 = vpop.f32.mrf.mxu3  ;;  %v1278_v8 = vmax.f32 %v1246_v2, 0.0  ;;  %v1049_v9 = vadd.f32 %v1048_v4, %v960_v3  ;;  %v962_v11 = vpop.f32.mrf.mxu1  ;;  %v1846_v2 = vld [vmem:[%s2020_s25 + $0x1cc] sm:$0xf]  ;;  %v1638_v3 = vld [vmem:[%s2020_s25 + $0x1d8] sm:$0xf0] }
  0xea   : > { %v963_v16 = vadd.f32 %v962_v11, %v873_v10 }
  0xeb   : > { %1310 = vst [vmem:[%s2136_s21 + $0x30] sm:$0xff] %v1278_v8  ;;  %v1138_v14 = vadd.f32 %v1137_v5, %v1049_v9  ;;  %912 = vmatmul.bf16.gmra.mxu0 %v1597_v6  ;;  %v1629_v8 = vor.u32 %v1847_v60, %v1628_v59  ;;  %v1633_v9 = vor.u32 %v1845_v62, %v1630_v63 }
  0xec   : > { %1001 = vmatmul.bf16.gmra.mxu1 %v1601_v7 }
  0xed   : > { %v1211_v15 = vmul.f32 %v2115_v18, %v1138_v14  ;;  %1090 = vmatmul.bf16.gmra.mxu2 %v1605_v12  ;;  %v1637_v14 = vor.u32 %v1848_v1, %v1636_v0 }
  0xee   : > { %1179 = vmatmul.bf16.gmra.mxu3 %v1609_v13 }
  0xef   : > { %v1247_v17 = vadd.f32 %v2120_v22, %v1211_v15  ;;  %v1641_v15 = vor.u32 %v1846_v2, %v1638_v3 }
  0xf0   : > { %v1051_v19 = vpop.f32.mrf.mxu2  ;;  %v875_v24 = vpop.f32.mrf.mxu0 }
  0xf1   : > { %v1140_v20 = vpop.f32.mrf.mxu3  ;;  %v1279_v21 = vmax.f32 %v1247_v17, 0.0  ;;  %v1052_v23 = vadd.f32 %v1051_v19, %v963_v16  ;;  %v964_v25 = vpop.f32.mrf.mxu1 }
  0xf2   : > { %v965_v37 = vadd.f32 %v964_v25, %v875_v24 }
  0xf3   : > { %1311 = vst [vmem:[%s2136_s21 + $0x38] sm:$0xff] %v1279_v21  ;;  %v1141_v26 = vadd.f32 %v1140_v20, %v1052_v23 }
  0xf5   : > { %v1212_v29 = vmul.f32 %v2115_v18, %v1141_v26 }
  0xf7   : > { %v1248_v36 = vadd.f32 %v2120_v22, %v1212_v29  ;;  %v1644_v29 = vld [vmem:[%s2020_s25 + $0x1e0] sm:$0xf] }
  0xf8   : > { %v1053_v38 = vpop.f32.mrf.mxu2  ;;  %v878_v44 = vpop.f32.mrf.mxu0 }
  0xf9   : > { %v1142_v39 = vpop.f32.mrf.mxu3  ;;  %v1280_v42 = vmax.f32 %v1248_v36, 0.0  ;;  %v1054_v43 = vadd.f32 %v1053_v38, %v965_v37  ;;  %v967_v45 = vpop.f32.mrf.mxu1  ;;  %v1850_v36 = vld [vmem:[%s2020_s25 + $0x1ec] sm:$0xf]  ;;  %v1654_v37 = vld [vmem:[%s2020_s25 + $0x1f8] sm:$0xf0] }
  0xfa   : > { %v968_v50 = vadd.f32 %v967_v45, %v878_v44 }
  0xfb   : > { %1312 = vst [vmem:[%s2136_s21 + $0x40] sm:$0xff] %v1280_v42  ;;  %v1143_v48 = vadd.f32 %v1142_v39, %v1054_v43  ;;  %917 = vmatmul.bf16.gmra.mxu0 %v1613_v40  ;;  %v1645_v42 = vor.u32 %v1851_v30, %v1644_v29  ;;  %v1649_v43 = vor.u32 %v1849_v32, %v1646_v33 }
  0xfc   : > { %1006 = vmatmul.bf16.gmra.mxu1 %v1617_v41 }
  0xfd   : > { %v1213_v49 = vmul.f32 %v2115_v18, %v1143_v48  ;;  %1095 = vmatmul.bf16.gmra.mxu2 %v1621_v46  ;;  %v1653_v48 = vor.u32 %v1852_v35, %v1652_v34 }
  0xfe   : > { %1184 = vmatmul.bf16.gmra.mxu3 %v1625_v47 }
  0xff   : > { %v1249_v51 = vadd.f32 %v2120_v22, %v1213_v49  ;;  %v1657_v49 = vor.u32 %v1850_v36, %v1654_v37 }
 0x100   : > { %v1056_v52 = vpop.f32.mrf.mxu2  ;;  %v880_v56 = vpop.f32.mrf.mxu0 }
 0x101   : > { %v1145_v53 = vpop.f32.mrf.mxu3  ;;  %v1281_v54 = vmax.f32 %v1249_v51, 0.0  ;;  %v1057_v55 = vadd.f32 %v1056_v52, %v968_v50  ;;  %v969_v57 = vpop.f32.mrf.mxu1 }
 0x102   : > { %v970_v5 = vadd.f32 %v969_v57, %v880_v56 }
 0x103   : > { %1313 = vst [vmem:[%s2136_s21 + $0x48] sm:$0xff] %v1281_v54  ;;  %v1146_v58 = vadd.f32 %v1145_v53, %v1057_v55 }
 0x105   : > { %v1214_v61 = vmul.f32 %v2115_v18, %v1146_v58 }
 0x107   : > { %v1250_v4 = vadd.f32 %v2120_v22, %v1214_v61 }
 0x108   : > { %v1058_v6 = vpop.f32.mrf.mxu2  ;;  %v883_v12 = vpop.f32.mrf.mxu0 }
 0x109   : > { %v1147_v7 = vpop.f32.mrf.mxu3  ;;  %v1282_v10 = vmax.f32 %v1250_v4, 0.0  ;;  %v1059_v11 = vadd.f32 %v1058_v6, %v970_v5  ;;  %v972_v13 = vpop.f32.mrf.mxu1 }
 0x10a   : > { %v973_v19 = vadd.f32 %v972_v13, %v883_v12 }
 0x10b   : > { %1314 = vst [vmem:[%s2136_s21 + $0x50] sm:$0xff] %v1282_v10  ;;  %v1148_v16 = vadd.f32 %v1147_v7, %v1059_v11  ;;  %922 = vmatmul.bf16.gmra.mxu0 %v1629_v8 }
 0x10c   : > { %1011 = vmatmul.bf16.gmra.mxu1 %v1633_v9 }
 0x10d   : > { %v1215_v17 = vmul.f32 %v2115_v18, %v1148_v16  ;;  %1100 = vmatmul.bf16.gmra.mxu2 %v1637_v14 }
 0x10e   : > { %1189 = vmatmul.bf16.gmra.mxu3 %v1641_v15 }
 0x10f   : > { %v1251_v20 = vadd.f32 %v2120_v22, %v1215_v17 }
 0x110   : > { %v1061_v21 = vpop.f32.mrf.mxu2  ;;  %v885_v26 = vpop.f32.mrf.mxu0 }
 0x111   : > { %v1150_v23 = vpop.f32.mrf.mxu3  ;;  %v1283_v24 = vmax.f32 %v1251_v20, 0.0  ;;  %v1062_v25 = vadd.f32 %v1061_v21, %v973_v19  ;;  %v974_v27 = vpop.f32.mrf.mxu1 }
 0x112   : > { %v975_v39 = vadd.f32 %v974_v27, %v885_v26 }
 0x113   : > { %1315 = vst [vmem:[%s2136_s21 + $0x58] sm:$0xff] %v1283_v24  ;;  %v1151_v28 = vadd.f32 %v1150_v23, %v1062_v25 }
 0x115   : > { %v1216_v31 = vmul.f32 %v2115_v18, %v1151_v28 }
 0x117   : > { %v1252_v38 = vadd.f32 %v2120_v22, %v1216_v31 }
 0x118   : > { %v1063_v40 = vpop.f32.mrf.mxu2  ;;  %v888_v46 = vpop.f32.mrf.mxu0 }
 0x119   : > { %v1152_v41 = vpop.f32.mrf.mxu3  ;;  %v1284_v44 = vmax.f32 %v1252_v38, 0.0  ;;  %v1064_v45 = vadd.f32 %v1063_v40, %v975_v39  ;;  %v977_v47 = vpop.f32.mrf.mxu1 }
 0x11a   : > { %v978_v52 = vadd.f32 %v977_v47, %v888_v46 }
 0x11b   : > { %1316 = vst [vmem:[%s2136_s21 + $0x60] sm:$0xff] %v1284_v44  ;;  %v1153_v50 = vadd.f32 %v1152_v41, %v1064_v45  ;;  %927 = vmatmul.bf16.gmra.mxu0 %v1645_v42 }
 0x11c   : > { %1016 = vmatmul.bf16.gmra.mxu1 %v1649_v43 }
 0x11d   : > { %v1217_v51 = vmul.f32 %v2115_v18, %v1153_v50  ;;  %1105 = vmatmul.bf16.gmra.mxu2 %v1653_v48 }
 0x11e   : > { %1194 = vmatmul.bf16.gmra.mxu3 %v1657_v49 }
 0x11f   : > { %v1253_v53 = vadd.f32 %v2120_v22, %v1217_v51 }
 0x120   : > { %v1066_v54 = vpop.f32.mrf.mxu2  ;;  %v890_v58 = vpop.f32.mrf.mxu0 }
 0x121   : > { %v1155_v55 = vpop.f32.mrf.mxu3  ;;  %v1285_v56 = vmax.f32 %v1253_v53, 0.0  ;;  %v1067_v57 = vadd.f32 %v1066_v54, %v978_v52  ;;  %v979_v59 = vpop.f32.mrf.mxu1 }
 0x122   : > { %v980_v63 = vadd.f32 %v979_v59, %v890_v58 }
 0x123   : > { %1317 = vst [vmem:[%s2136_s21 + $0x68] sm:$0xff] %v1285_v56  ;;  %v1156_v60 = vadd.f32 %v1155_v55, %v1067_v57 }
 0x125   : > { %v1218_v61 = vmul.f32 %v2115_v18, %v1156_v60 }
 0x127   : > { %v1254_v62 = vadd.f32 %v2120_v22, %v1218_v61 }
 0x128   : > { %v1068_v0 = vpop.f32.mrf.mxu2  ;;  %v893_v4 = vpop.f32.mrf.mxu0 }
 0x129   : > { %v1157_v1 = vpop.f32.mrf.mxu3  ;;  %v1286_v2 = vmax.f32 %v1254_v62, 0.0  ;;  %v1069_v3 = vadd.f32 %v1068_v0, %v980_v63  ;;  %v982_v5 = vpop.f32.mrf.mxu1 }
 0x12a   : > { %v983_v8 = vadd.f32 %v982_v5, %v893_v4 }
 0x12b   : > { %1318 = vst [vmem:[%s2136_s21 + $0x70] sm:$0xff] %v1286_v2  ;;  %v1158_v6 = vadd.f32 %v1157_v1, %v1069_v3 }
 0x12d   : > { %v1219_v7 = vmul.f32 %v2115_v18, %v1158_v6 }
 0x12f   : > { %v1255_v9 = vadd.f32 %v2120_v22, %v1219_v7 }
 0x130   : > { %v1071_v10 = vpop.f32.mrf.mxu2  ;;  %v895_v14 = vpop.f32.mrf.mxu0 }
 0x131   : > { %v1160_v11 = vpop.f32.mrf.mxu3  ;;  %v1287_v12 = vmax.f32 %v1255_v9, 0.0  ;;  %v1072_v13 = vadd.f32 %v1071_v10, %v983_v8  ;;  %v984_v15 = vpop.f32.mrf.mxu1 }
 0x132   : > { %v985_v20 = vadd.f32 %v984_v15, %v895_v14 }
 0x133   : > { %1319 = vst [vmem:[%s2136_s21 + $0x78] sm:$0xff] %v1287_v12  ;;  %v1161_v16 = vadd.f32 %v1160_v11, %v1072_v13 }
 0x135   : > { %v1220_v17 = vmul.f32 %v2115_v18, %v1161_v16 }
 0x137   : > { %v1256_v19 = vadd.f32 %v2120_v22, %v1220_v17 }
 0x138   : > { %v1073_v21 = vpop.f32.mrf.mxu2  ;;  %v898_v26 = vpop.f32.mrf.mxu0 }
 0x139   : > { %v1162_v23 = vpop.f32.mrf.mxu3  ;;  %v1288_v24 = vmax.f32 %v1256_v19, 0.0  ;;  %v1074_v25 = vadd.f32 %v1073_v21, %v985_v20  ;;  %v987_v27 = vpop.f32.mrf.mxu1 }
 0x13a   : > { %v988_v30 = vadd.f32 %v987_v27, %v898_v26 }
 0x13b   : > { %1320 = vst [vmem:[%s2136_s21 + $0x80] sm:$0xff] %v1288_v24  ;;  %v1163_v28 = vadd.f32 %v1162_v23, %v1074_v25 }
 0x13d   : > { %v1221_v29 = vmul.f32 %v2115_v18, %v1163_v28 }
 0x13f   : > { %v1257_v31 = vadd.f32 %v2120_v22, %v1221_v29 }
 0x140   : > { %v1076_v32 = vpop.f32.mrf.mxu2  ;;  %v900_v36 = vpop.f32.mrf.mxu0 }
 0x141   : > { %v1165_v33 = vpop.f32.mrf.mxu3  ;;  %v1289_v34 = vmax.f32 %v1257_v31, 0.0  ;;  %v1077_v35 = vadd.f32 %v1076_v32, %v988_v30  ;;  %v989_v37 = vpop.f32.mrf.mxu1 }
 0x142   : > { %v990_v41 = vadd.f32 %v989_v37, %v900_v36 }
 0x143   : > { %1321 = vst [vmem:[%s2136_s21 + $0x88] sm:$0xff] %v1289_v34  ;;  %v1166_v38 = vadd.f32 %v1165_v33, %v1077_v35 }
 0x145   : > { %v1222_v39 = vmul.f32 %v2115_v18, %v1166_v38 }
 0x147   : > { %v1258_v40 = vadd.f32 %v2120_v22, %v1222_v39 }
 0x148   : > { %v1078_v42 = vpop.f32.mrf.mxu2  ;;  %v903_v46 = vpop.f32.mrf.mxu0 }
 0x149   : > { %v1167_v43 = vpop.f32.mrf.mxu3  ;;  %v1290_v44 = vmax.f32 %v1258_v40, 0.0  ;;  %v1079_v45 = vadd.f32 %v1078_v42, %v990_v41  ;;  %v992_v47 = vpop.f32.mrf.mxu1 }
 0x14a   : > { %v993_v50 = vadd.f32 %v992_v47, %v903_v46 }
 0x14b   : > { %1322 = vst [vmem:[%s2136_s21 + $0x90] sm:$0xff] %v1290_v44  ;;  %v1168_v48 = vadd.f32 %v1167_v43, %v1079_v45 }
 0x14d   : > { %v1223_v49 = vmul.f32 %v2115_v18, %v1168_v48 }
 0x14f   : > { %v1259_v51 = vadd.f32 %v2120_v22, %v1223_v49 }
 0x150   : > { %v1081_v52 = vpop.f32.mrf.mxu2  ;;  %v905_v56 = vpop.f32.mrf.mxu0 }
 0x151   : > { %v1170_v53 = vpop.f32.mrf.mxu3  ;;  %v1291_v54 = vmax.f32 %v1259_v51, 0.0  ;;  %v1082_v55 = vadd.f32 %v1081_v52, %v993_v50  ;;  %v994_v57 = vpop.f32.mrf.mxu1 }
 0x152   : > { %v995_v61 = vadd.f32 %v994_v57, %v905_v56 }
 0x153   : > { %1323 = vst [vmem:[%s2136_s21 + $0x98] sm:$0xff] %v1291_v54  ;;  %v1171_v58 = vadd.f32 %v1170_v53, %v1082_v55 }
 0x155   : > { %v1224_v59 = vmul.f32 %v2115_v18, %v1171_v58 }
 0x157   : > { %v1260_v60 = vadd.f32 %v2120_v22, %v1224_v59 }
 0x158   : > { %v1083_v62 = vpop.f32.mrf.mxu2  ;;  %v908_v2 = vpop.f32.mrf.mxu0 }
 0x159   : > { %v1172_v63 = vpop.f32.mrf.mxu3  ;;  %v1292_v0 = vmax.f32 %v1260_v60, 0.0  ;;  %v1084_v1 = vadd.f32 %v1083_v62, %v995_v61  ;;  %v997_v3 = vpop.f32.mrf.mxu1 }
 0x15a   : > { %v998_v6 = vadd.f32 %v997_v3, %v908_v2 }
 0x15b   : > { %1324 = vst [vmem:[%s2136_s21 + $0xa0] sm:$0xff] %v1292_v0  ;;  %v1173_v4 = vadd.f32 %v1172_v63, %v1084_v1 }
 0x15d   : > { %v1225_v5 = vmul.f32 %v2115_v18, %v1173_v4 }
 0x15f   : > { %v1261_v7 = vadd.f32 %v2120_v22, %v1225_v5 }
 0x160   : > { %v1086_v8 = vpop.f32.mrf.mxu2  ;;  %v910_v12 = vpop.f32.mrf.mxu0 }
 0x161   : > { %v1175_v9 = vpop.f32.mrf.mxu3  ;;  %v1293_v10 = vmax.f32 %v1261_v7, 0.0  ;;  %v1087_v11 = vadd.f32 %v1086_v8, %v998_v6  ;;  %v999_v13 = vpop.f32.mrf.mxu1 }
 0x162   : > { %v1000_v17 = vadd.f32 %v999_v13, %v910_v12 }
 0x163   : > { %1325 = vst [vmem:[%s2136_s21 + $0xa8] sm:$0xff] %v1293_v10  ;;  %v1176_v14 = vadd.f32 %v1175_v9, %v1087_v11 }
 0x165   : > { %v1226_v15 = vmul.f32 %v2115_v18, %v1176_v14 }
 0x167   : > { %v1262_v16 = vadd.f32 %v2120_v22, %v1226_v15 }
 0x168   : > { %v1088_v19 = vpop.f32.mrf.mxu2  ;;  %v913_v24 = vpop.f32.mrf.mxu0 }
 0x169   : > { %v1177_v20 = vpop.f32.mrf.mxu3  ;;  %v1294_v21 = vmax.f32 %v1262_v16, 0.0  ;;  %v1089_v23 = vadd.f32 %v1088_v19, %v1000_v17  ;;  %v1002_v25 = vpop.f32.mrf.mxu1 }
 0x16a   : > { %v1003_v28 = vadd.f32 %v1002_v25, %v913_v24 }
 0x16b   : > { %1326 = vst [vmem:[%s2136_s21 + $0xb0] sm:$0xff] %v1294_v21  ;;  %v1178_v26 = vadd.f32 %v1177_v20, %v1089_v23 }
 0x16d   : > { %v1227_v27 = vmul.f32 %v2115_v18, %v1178_v26 }
 0x16f   : > { %v1263_v29 = vadd.f32 %v2120_v22, %v1227_v27 }
 0x170   : > { %v1091_v30 = vpop.f32.mrf.mxu2  ;;  %v915_v34 = vpop.f32.mrf.mxu0 }
 0x171   : > { %v1180_v31 = vpop.f32.mrf.mxu3  ;;  %v1295_v32 = vmax.f32 %v1263_v29, 0.0  ;;  %v1092_v33 = vadd.f32 %v1091_v30, %v1003_v28  ;;  %v1004_v35 = vpop.f32.mrf.mxu1 }
 0x172   : > { %v1005_v39 = vadd.f32 %v1004_v35, %v915_v34 }
 0x173   : > { %1327 = vst [vmem:[%s2136_s21 + $0xb8] sm:$0xff] %v1295_v32  ;;  %v1181_v36 = vadd.f32 %v1180_v31, %v1092_v33 }
 0x175   : > { %v1228_v37 = vmul.f32 %v2115_v18, %v1181_v36 }
 0x177   : > { %v1264_v38 = vadd.f32 %v2120_v22, %v1228_v37 }
 0x178   : > { %v1093_v40 = vpop.f32.mrf.mxu2  ;;  %v918_v44 = vpop.f32.mrf.mxu0 }
 0x179   : > { %v1182_v41 = vpop.f32.mrf.mxu3  ;;  %v1296_v42 = vmax.f32 %v1264_v38, 0.0  ;;  %v1094_v43 = vadd.f32 %v1093_v40, %v1005_v39  ;;  %v1007_v45 = vpop.f32.mrf.mxu1 }
 0x17a   : > { %v1008_v48 = vadd.f32 %v1007_v45, %v918_v44 }
 0x17b   : > { %1328 = vst [vmem:[%s2136_s21 + $0xc0] sm:$0xff] %v1296_v42  ;;  %v1183_v46 = vadd.f32 %v1182_v41, %v1094_v43 }
 0x17d   : > { %v1229_v47 = vmul.f32 %v2115_v18, %v1183_v46 }
 0x17f   : > { %v1265_v49 = vadd.f32 %v2120_v22, %v1229_v47 }
 0x180   : > { %v1096_v50 = vpop.f32.mrf.mxu2  ;;  %v920_v54 = vpop.f32.mrf.mxu0 }
 0x181   : > { %v1185_v51 = vpop.f32.mrf.mxu3  ;;  %v1297_v52 = vmax.f32 %v1265_v49, 0.0  ;;  %v1097_v53 = vadd.f32 %v1096_v50, %v1008_v48  ;;  %v1009_v55 = vpop.f32.mrf.mxu1 }
 0x182   : > { %v1010_v59 = vadd.f32 %v1009_v55, %v920_v54 }
 0x183   : > { %1329 = vst [vmem:[%s2136_s21 + $0xc8] sm:$0xff] %v1297_v52  ;;  %v1186_v56 = vadd.f32 %v1185_v51, %v1097_v53 }
 0x185   : > { %v1230_v57 = vmul.f32 %v2115_v18, %v1186_v56 }
 0x187   : > { %v1266_v58 = vadd.f32 %v2120_v22, %v1230_v57 }
 0x188   : > { %v1098_v60 = vpop.f32.mrf.mxu2  ;;  %v923_v0 = vpop.f32.mrf.mxu0 }
 0x189   : > { %v1187_v61 = vpop.f32.mrf.mxu3  ;;  %v1298_v62 = vmax.f32 %v1266_v58, 0.0  ;;  %v1099_v63 = vadd.f32 %v1098_v60, %v1010_v59  ;;  %v1012_v1 = vpop.f32.mrf.mxu1 }
 0x18a   : > { %v1013_v4 = vadd.f32 %v1012_v1, %v923_v0 }
 0x18b   : > { %1330 = vst [vmem:[%s2136_s21 + $0xd0] sm:$0xff] %v1298_v62  ;;  %v1188_v2 = vadd.f32 %v1187_v61, %v1099_v63 }
 0x18d   : > { %v1231_v3 = vmul.f32 %v2115_v18, %v1188_v2 }
 0x18f   : > { %v1267_v5 = vadd.f32 %v2120_v22, %v1231_v3 }
 0x190   : > { %v1101_v6 = vpop.f32.mrf.mxu2  ;;  %v925_v10 = vpop.f32.mrf.mxu0 }
 0x191   : > { %v1190_v7 = vpop.f32.mrf.mxu3  ;;  %v1299_v8 = vmax.f32 %v1267_v5, 0.0  ;;  %v1102_v9 = vadd.f32 %v1101_v6, %v1013_v4  ;;  %v1014_v11 = vpop.f32.mrf.mxu1 }
 0x192   : > { %v1015_v15 = vadd.f32 %v1014_v11, %v925_v10 }
 0x193   : > { %1331 = vst [vmem:[%s2136_s21 + $0xd8] sm:$0xff] %v1299_v8  ;;  %v1191_v12 = vadd.f32 %v1190_v7, %v1102_v9 }
 0x195   : > { %v1232_v13 = vmul.f32 %v2115_v18, %v1191_v12 }
 0x197   : > { %v1268_v14 = vadd.f32 %v2120_v22, %v1232_v13 }
 0x198   : > { %v1103_v16 = vpop.f32.mrf.mxu2  ;;  %v928_v21 = vpop.f32.mrf.mxu0 }
 0x199   : > { %v1192_v17 = vpop.f32.mrf.mxu3  ;;  %v1300_v19 = vmax.f32 %v1268_v14, 0.0  ;;  %v1104_v20 = vadd.f32 %v1103_v16, %v1015_v15  ;;  %v1017_v23 = vpop.f32.mrf.mxu1 }
 0x19a   : > { %v1018_v26 = vadd.f32 %v1017_v23, %v928_v21 }
 0x19b   : > { %1332 = vst [vmem:[%s2136_s21 + $0xe0] sm:$0xff] %v1300_v19  ;;  %v1193_v24 = vadd.f32 %v1192_v17, %v1104_v20 }
 0x19d   : > { %v1233_v25 = vmul.f32 %v2115_v18, %v1193_v24 }
 0x19f   : > { %v1269_v27 = vadd.f32 %v2120_v22, %v1233_v25 }
 0x1a0   : > { %v1106_v28 = vpop.f32.mrf.mxu2  ;;  %v930_v33 = vpop.f32.mrf.mxu0 }
 0x1a1   : > { %v1195_v29 = vpop.f32.mrf.mxu3  ;;  %v1301_v30 = vmax.f32 %v1269_v27, 0.0  ;;  %v1107_v31 = vadd.f32 %v1106_v28, %v1018_v26  ;;  %v1019_v34 = vpop.f32.mrf.mxu1 }
 0x1a2   : > { %v1020_v37 = vadd.f32 %v1019_v34, %v930_v33 }
 0x1a3   : > { %1333 = vst [vmem:[%s2136_s21 + $0xe8] sm:$0xff] %v1301_v30  ;;  %v1196_v32 = vadd.f32 %v1195_v29, %v1107_v31 }
 0x1a5   : > { %v1234_v35 = vmul.f32 %v2115_v18, %v1196_v32 }
 0x1a7   : > { %v1270_v36 = vadd.f32 %v2120_v22, %v1234_v35 }
 0x1a8   : > { %v1108_v38 = vpop.f32.mrf.mxu2 }
 0x1a9   : > { %v1302_v39 = vmax.f32 %v1270_v36, 0.0  ;;  %v1109_v40 = vadd.f32 %v1108_v38, %v1020_v37  ;;  %v1197_v41 = vpop.f32.mrf.mxu3 }
 0x1ab   : > { %1334 = vst [vmem:[%s2136_s21 + $0xf0] sm:$0xff] %v1302_v39  ;;  %v1198_v42 = vadd.f32 %v1197_v41, %v1109_v40 }
 0x1ad   : > { %v1235_v43 = vmul.f32 %v2115_v18, %v1198_v42 }
 0x1af   : > { %v1271_v44 = vadd.f32 %v2120_v22, %v1235_v43 }
 0x1b1   : > { %v1303_v45 = vmax.f32 %v1271_v44, 0.0 }
 0x1b3   : > { %1335 = vst [vmem:[%s2136_s21 + $0xf8] sm:$0xff] %v1303_v45 }
 0x1b4 PF: > { %s14_s15 = sadd.s32 1, %s1901_s15  }
 0x1b5   : > { %p11_p4 = scmp.ge.s32.totalorder %s14_s15, 4  }
 0x1b7   :  { %13 = sbr.rel (!%p11_p4) target bundleno = 1 (0x1), region = 66 }

</bundles_post_ra>
